<compile_context>
chip_gen: v7x
topology: tpu7x:2x2x1
jax: 0.10.0
libtpu: 0.0.40
codegen_flags: <defaults>
</compile_context>

<pallas_src>
import math

import jax
import jax.numpy as jnp
from jax.experimental import pallas as pl
from jax.experimental.pallas import tpu as pltpu


_LANE = 128
_TILE_BUDGET = 4 << 20   # ~4 MiB per VMEM tile (mem-bound knee; 2 bufs x (in+out)
                         # x 4 MiB = 16 MiB double-buffered footprint)
_VMEM_LIMIT = 48 << 20   # explicit scoped-VMEM limit; headroom under v7x's 64 MiB


# ---------------------------------------------------------------------------
# Module-equivalent forward (recommended path): metadata-only reshape.
# ---------------------------------------------------------------------------
def flatten(x: jax.Array) -> jax.Array:
    """Pallas-free equivalent of Flatten.forward: (N, *dims) -> (N, prod(dims))."""
    n = x.shape[0]
    flat = int(math.prod(x.shape[1:])) if x.ndim > 1 else 1
    return x.reshape(n, flat)


# ---------------------------------------------------------------------------
# Pallas copy kernel (only if a materialized copy is genuinely required).
# ---------------------------------------------------------------------------
def _copy_kernel(x_ref, o_ref):
    # Pure lane-dense tile copy.
    o_ref[...] = x_ref[...]


def _sublane_pack(dtype) -> int:
    # Native sublane packing: 8 rows/vreg for 32-bit, 16 for bf16, 32 for int8.
    return max(8, 32 // max(1, jnp.dtype(dtype).itemsize))


def _choose_lane(total: int, sub_pack: int):
    """Largest lane width (multiple of 128) that divides total; prefer widths
    leaving the row count a multiple of the native sublane packing."""
    if total % _LANE != 0:
        return None
    cands = (16384, 8192, 4096, 2048, 1024, 512, 256, 128)
    for c in cands:
        if total % c == 0 and (total // c) % sub_pack == 0:
            return c
    for c in cands:
        if total % c == 0:
            return c
    return None


def _choose_rows(rows: int, lane: int, itemsize: int, sub_pack: int):
    """Sublane block: multiple of the dtype's native packing, <= ~4 MiB tile,
    and (when possible) leaving >= 2 grid steps for v7x's second TensorCore."""
    if rows <= sub_pack:
        return rows  # full-extent block (exempt from the (8,128) rule)
    if rows % sub_pack != 0:
        return None
    cap = max(sub_pack, _TILE_BUDGET // max(1, lane * itemsize))
    cap = min(cap, rows)
    if rows >= 4 * sub_pack:
        cap = min(cap, max(sub_pack, rows // 2))  # keep >= 2 grid steps
    c = (cap // sub_pack) * sub_pack
    while c >= sub_pack:
        if rows % c == 0:
            return c
        c -= sub_pack
    return sub_pack


def _pick_block(dim: int, candidates) -> int:
    """Largest candidate that exactly divides `dim`, else the full dim."""
    for c in candidates:
        if c <= dim and dim % c == 0:
            return c
    return dim


def flatten_materialized(x: jax.Array) -> jax.Array:
    """Pallas copy with Flatten semantics; prefer `flatten` (copy-free)."""
    n = x.shape[0]
    flat = int(math.prod(x.shape[1:])) if x.ndim > 1 else 1
    total = n * flat
    x2 = x.reshape(n, flat)  # metadata-only

    if total == 0:
        return x2  # nothing to copy; avoid a 0-extent grid

    dtype = x.dtype
    itemsize = jnp.dtype(dtype).itemsize
    sub_pack = _sublane_pack(dtype)

    lane = _choose_lane(total, sub_pack)
    bn = None
    if lane is not None:
        rows = total // lane
        bn = _choose_rows(rows, lane, itemsize, sub_pack)

    if lane is not None and bn is not None:
        # Lane-dense 1-D retiling over the flattened extent.
        x1 = x2.reshape(rows, lane)  # metadata-only
        out = pl.pallas_call(
            _copy_kernel,
            out_shape=jax.ShapeDtypeStruct((rows, lane), dtype),
            grid_spec=pl.GridSpec(
                grid=(rows // bn,),
                in_specs=[pl.BlockSpec((bn, lane), lambda i: (i, 0))],
                out_specs=pl.BlockSpec((bn, lane), lambda i: (i, 0)),
            ),
            input_output_aliases={0: 0},
            compiler_params=pltpu.CompilerParams(
                dimension_semantics=("parallel",),
                vmem_limit_bytes=_VMEM_LIMIT,
            ),
        )(x1)
        return out.reshape(n, flat)  # metadata-only

    # Fallback: 2-D tiling over (n, flat) when total has no lane-dense
    # factorization (may use masked stores; correctness is unaffected).
    bf = _pick_block(flat, (8192, 4096, 2048, 1024, 512, 256, 128))
    bn2 = _pick_block(n, tuple(sub_pack * m for m in (16, 8, 4, 2, 1)))
    return pl.pallas_call(
        _copy_kernel,
        out_shape=jax.ShapeDtypeStruct((n, flat), dtype),
        grid_spec=pl.GridSpec(
            grid=(n // bn2, flat // bf),
            in_specs=[pl.BlockSpec((bn2, bf), lambda i, j: (i, j))],
            out_specs=pl.BlockSpec((bn2, bf), lambda i, j: (i, j)),
        ),
        input_output_aliases={0: 0},
        compiler_params=pltpu.CompilerParams(
            dimension_semantics=("parallel", "parallel"),
            vmem_limit_bytes=_VMEM_LIMIT,
        ),
    )(x2)


if __name__ == "__main__":
    key = jax.random.PRNGKey(0)
    # Small NCHW input consistent with typical conv feature maps.
    x = jax.random.normal(key, (2, 4, 16, 16), dtype=jnp.float32)

    y_ref = x.reshape(x.shape[0], -1)

    # Primary (copy-free) module-equivalent forward.
    y = jax.block_until_ready(flatten(x))
    assert y.shape == (2, 4 * 16 * 16), y.shape
    assert y.dtype == x.dtype
    assert jnp.array_equal(y, y_ref), "flatten mismatch vs reference"

    # Pallas materialized-copy path (aliased, lane-dense tiles).
    y2 = jax.block_until_ready(flatten_materialized(x))
    assert y2.shape == (2, 4 * 16 * 16), y2.shape
    assert y2.dtype == x.dtype
    assert jnp.array_equal(y2, y_ref), "flatten_materialized mismatch vs reference"

    # Exercise the dtype-aware tiling on a bf16 input as well.
    xb = jax.random.normal(jax.random.PRNGKey(0), (4, 8, 32)).astype(jnp.bfloat16)
    yb = jax.block_until_ready(flatten_materialized(xb))
    assert jnp.array_equal(yb, xb.reshape(4, -1)), "bf16 flatten mismatch"

    print("KERNEL_OK")
</pallas_src>

<mosaic_0001>
module attributes {stable_mosaic.version = 11 : i64} {
  func.func @_copy_kernel(%arg0: i32, %arg1: memref<8x256xf32, #tpu.memory_space<vmem>>, %arg2: memref<8x256xf32, #tpu.memory_space<vmem>>) attributes {dimension_semantics = [#tpu.dimension_semantics<parallel>], iteration_bounds = array<i64: 1>, scalar_prefetch = 0 : i64, scratch_operands = 0 : i64, tpu.core_type = #tpu.core_type<tc>, window_params = [{transform_indices = @transform_0, window_bounds = array<i64: 8, 256>}, {transform_indices = @transform_1, window_bounds = array<i64: 8, 256>}]} {
    %c0 = arith.constant 0 : index
    %c0_0 = arith.constant 0 : index
    %0 = vector.load %arg1[%c0, %c0_0] : memref<8x256xf32, #tpu.memory_space<vmem>>, vector<8x256xf32>
    %c0_1 = arith.constant 0 : index
    %c0_2 = arith.constant 0 : index
    %1 = vector.load %arg2[%c0_1, %c0_2] : memref<8x256xf32, #tpu.memory_space<vmem>>, vector<8x256xf32>
    tpu.vector_store %arg2[%c0_1, %c0_2], %0 {strides = array<i32>} : memref<8x256xf32, #tpu.memory_space<vmem>>, vector<8x256xf32>,
    return
  }
  func.func @transform_0(%arg0: i32) -> (i32, i32) {
    %c0_i32 = arith.constant 0 : i32
    %c0_i32_0 = arith.constant 0 : i32
    return %arg0, %c0_i32 : i32, i32
  }
  func.func @transform_1(%arg0: i32) -> (i32, i32) {
    %c0_i32 = arith.constant 0 : i32
    %c0_i32_0 = arith.constant 0 : i32
    return %arg0, %c0_i32 : i32, i32
  }
}

</mosaic_0001>

<bundles_post_ra>
// kernel: tpu_custom_call.1
= control target key start
LH: loop header
LB: loop body
LE: loop exit
PB: predicated region body
PF: predicated region fallthrough
CT: control target
= control target key end

     0   :  { %6 = vsyncpa [#allocation3], 0  ;;  %s126_s0 = inlined_call_operand.hbm [shape: f32[8,256], index: 0, kind: input, shape index: {}, may-alias: {0,1}]   ;;  %s127_s1 = inlined_call_operand.hbm [shape: f32[8,256], index: 1, kind: output, shape index: {}, may-alias: {0,1}]  }
   0x1   :  { %7 = vsyncpa [#allocation4], 0  ;;  %s90_s6 = smov [#allocation2]   ;;  %s42_s10 = scalar_lea.hbm %s126_s0, 256 }
   0x2   :  { %s14_s7 = sshll.u32 %s90_s6, 4  ;;  %p43_p0 = scmp.ne.s32.totalorder %s126_s0, %s42_s10  ;;  %s15_s7 = int_to_ptr.vmem [resolvable:$true] %s14_s7 }
   0x3   :  { %p46_p1 = scmp.lt.u32.totalorder %s42_s10, %s126_s0 }
   0x5   :  { %p48_p2 = pnand %p46_p1, %p43_p0 }
   0x7   :  { %51 = shalt.err (!%p48_p2)
}
   0x8   :  { %s52_s15 = scalar_lea.vmem %s15_s7, 256  ;;  %p57_p4 = scmp.lt.s32.totalorder %s15_s7, %s15_s7 }
   0x9   :  { %p53_p3 = scmp.ne.s32.totalorder %s15_s7, %s52_s15  ;;  %p58_p5 = scmp.lt.s32.totalorder %s52_s15, %s52_s15 }
   0xb   :  { %p59_p6 = por %p58_p5, %p57_p4 }
   0xd   :  { %p60_p7 = pnand %p59_p6, %p53_p3 }
   0xf   :  { %63 = shalt.err (!%p60_p7)
}
  0x10   :  { %17 = dma.hbm_to_vmem [thread:$0]  %s126_s0, 256, %s15_s7, [#allocation3]  }
  0x11   :  { %86 = dma.done.wait [#allocation3], 256  }
  0x12   :  { %87 = vsyncadd [#allocation3], 4294967040  ;;  %s91_s18 = smov [#allocation5]   ;;  %v21_v0 = vld [vmem:[#allocation2] sm:$0xff]  ;;  %v22_v1 = vld [vmem:[#allocation2 + $0x8] sm:$0xff] }
  0x13   :  { %s31_s19 = sshll.u32 %s91_s18, 4  ;;  %23 = vst [vmem:[#allocation5] sm:$0xff] %v21_v0  ;;  %24 = vst [vmem:[#allocation5 + $0x8] sm:$0xff] %v22_v1  ;;  %s32_s19 = int_to_ptr.vmem [resolvable:$true] %s31_s19 }
  0x14   :  { %s64_s20 = scalar_lea.vmem %s32_s19, 256  ;;  %p69_p9 = scmp.lt.s32.totalorder %s32_s19, %s32_s19 }
  0x15   :  { %p65_p8 = scmp.ne.s32.totalorder %s32_s19, %s64_s20  ;;  %p70_p10 = scmp.lt.s32.totalorder %s64_s20, %s64_s20 }
  0x17   :  { %p71_p11 = por %p70_p10, %p69_p9 }
  0x19   :  { %p72_p12 = pnand %p71_p11, %p65_p8 }
  0x1b   :  { %75 = shalt.err (!%p72_p12)
}
  0x1c   :  { %s76_s0 = scalar_lea.hbm %s127_s1, 256 }
  0x1d   :  { %p77_p13 = scmp.ne.s32.totalorder %s127_s1, %s76_s0  ;;  %p80_p0 = scmp.lt.u32.totalorder %s76_s0, %s127_s1 }
  0x1f   :  { %p82_p1 = pnand %p80_p0, %p77_p13 }
  0x21   :  { %85 = shalt.err (!%p82_p1)
}
  0x22   :  { %34 = dma.vmem_to_hbm [thread:$0]  %s32_s19, 256, %s127_s1, [#allocation4]  }
  0x23   :  { %88 = dma.done.wait [#allocation4], 256  }
  0x24   :  { %89 = vsyncadd [#allocation4], 4294967040 }
  0x25   :  { %38 = vsyncpa [#allocation3], 1 }
  0x26   :  { %39 = vsyncpa [#allocation4], 1 }

</bundles_post_ra>
